<compile_context>
chip_gen: v5e
topology: v5e:2x2
jax: 0.10.0
libtpu: 0.0.40
codegen_flags: <defaults>
</compile_context>

<pallas_src>
import functools

import jax
import jax.numpy as jnp
import numpy as np
from jax import lax
from jax.experimental import pallas as pl
from jax.experimental.pallas import tpu as pltpu


# ---------------------------------------------------------------------------
# Chip introspection (conservative fallbacks; never raises).
# ---------------------------------------------------------------------------
def _tpu_topology():
    """Return (tensorcores_per_chip, vpu_has_bf16)."""
    cores, bf16_vpu = 1, True
    try:
        kind = jax.devices()[0].device_kind.lower()
    except Exception:
        return cores, bf16_vpu
    # v2..v5 generations have no bf16 VALU path worth using for elementwise.
    for tag in ("v2", "v3", "v4", "v5"):
        if tag in kind:
            bf16_vpu = False
    if "v7" in kind:
        cores = 2          # two TensorCores per chip on v7x
    return cores, bf16_vpu


@functools.lru_cache(maxsize=None)
def _buffered_resident_supported():
    """Probe once whether pipeline_mode=pl.Buffered(1) lowers on this backend."""
    try:
        def _copy(x_ref, o_ref):
            o_ref[...] = x_ref[...]

        spec = pl.BlockSpec((8, 128), lambda i: (0, 0), pipeline_mode=pl.Buffered(1))
        fn = pl.pallas_call(
            _copy,
            out_shape=jax.ShapeDtypeStruct((8, 128), jnp.float32),
            grid=(1,),
            in_specs=[spec],
            out_specs=pl.BlockSpec((8, 128), lambda i: (0, 0)),
        )
        jax.block_until_ready(fn(jnp.zeros((8, 128), jnp.float32)))
        return True
    except Exception:
        return False


def _resident_spec(shape):
    """BlockSpec for an operand that is fully resident across the grid."""
    imap = lambda i: (0,) * len(shape)
    if _buffered_resident_supported():
        return pl.BlockSpec(shape, imap, pipeline_mode=pl.Buffered(1))
    return pl.BlockSpec(shape, imap)


# ---------------------------------------------------------------------------
# Kernel: one grid step == one batch tile; full L-layer chain inside the body.
# ---------------------------------------------------------------------------
def _gmapping_kernel(x_ref, w_ref, b_ref, o_ref, *, num_layers, normalize_latents,
                     eps, ew_dtype, interleave):
    mm_dtype = w_ref.dtype            # dot operand dtype (f32 or bf16)
    rows = x_ref.shape[0]

    if interleave:
        half = rows // 2
        row_slices = [pl.ds(0, half), pl.ds(half, half)]
    else:
        row_slices = [pl.ds(0, rows)]

    # Load (and optionally pixel-norm) each batch half; keep activations in
    # ew_dtype (f32, or bf16 on chips with a bf16 VPU).
    parts = []
    for sl in row_slices:
        t = x_ref[sl, :].astype(jnp.float32)
        if normalize_latents:
            # PixelNormLayer: x * rsqrt(mean(x^2, dim=1) + eps)
            t = t * lax.rsqrt(jnp.mean(t * t, axis=-1, keepdims=True) + eps)
        parts.append(t.astype(ew_dtype))

    def apply_layer(l, parts):
        w = w_ref[l]                                       # (D, D), static index
        b = b_ref[pl.ds(l, 1), :].astype(ew_dtype)          # (1, D), static index
        outs = []
        for t in parts:                                     # independent halves
            y = jnp.dot(t.astype(mm_dtype), w, preferred_element_type=jnp.float32)
            y = y.astype(ew_dtype) + b                      # bias (pre-scaled by b_mul)
            # LeakyReLU(0.2).  Matches the reference for finite inputs; NaN/-0
            # propagation differs from where(h>=0,...) but that is acceptable here.
            outs.append(jnp.maximum(y, 0.2 * y))
        return outs

    # Fully unrolled, static-index layer chain (strict dependence per half, so
    # live ranges stay short; the two halves give the scheduler independent
    # MXU pushes to hide result-FIFO drain).
    for l in range(num_layers):
        parts = apply_layer(l, parts)

    for sl, t in zip(row_slices, parts):
        o_ref[sl, :] = t.astype(o_ref.dtype)


# ---------------------------------------------------------------------------
# Wrapper.
# ---------------------------------------------------------------------------
def gmapping_forward(x, w_eff, b_eff, dlatent_broadcast=None,
                     normalize_latents=False, eps=1e-8, block_b=None):
    """x: (B, D) f32.  w_eff: (L, D, D) per-layer (in, out) weights pre-scaled by
    w_mul (f32 or bf16).  b_eff: (L, D) f32 biases pre-scaled by b_mul."""
    B, D = x.shape
    L, d_in, d_out = w_eff.shape
    assert d_in == D and d_out == D, "kernel carries a fixed-width activation"
    assert b_eff.shape == (L, D)

    cores, vpu_bf16 = _tpu_topology()

    # ---- batch tile selection --------------------------------------------
    if block_b is None:
        block_b = B if B <= 4096 else 2048     # big tiles: amortize step overhead
    if block_b >= B:
        block_b = B                            # full-array block (no (8,) rule)
    else:
        block_b = max(8, (block_b // 8) * 8)   # sublane-aligned tile
    # v7x: keep >= one grid step per TensorCore so the parallel axis shards.
    if cores > 1 and B >= 512:
        per_core = -(-B // cores)
        per_core = ((per_core + 255) // 256) * 256
        if block_b > per_core:
            block_b = per_core
    grid_b = pl.cdiv(B, block_b)

    interleave = (block_b >= 16) and (block_b % 16 == 0)

    # Elementwise dtype: bf16 only when weights are low precision AND the VPU
    # has a native bf16 path (v6e/v7x); v5e keeps f32 elementwise.
    w_low = jnp.dtype(w_eff.dtype) != jnp.dtype(jnp.float32)
    ew_dtype = jnp.bfloat16 if (w_low and vpu_bf16) else jnp.float32

    kernel = functools.partial(
        _gmapping_kernel,
        num_layers=L,
        normalize_latents=normalize_latents,
        eps=eps,
        ew_dtype=ew_dtype,
        interleave=interleave,
    )

    # ---- VMEM budget / compiler params -------------------------------------
    x_bytes = jnp.dtype(x.dtype).itemsize
    w_bytes = jnp.dtype(w_eff.dtype).itemsize
    budget = (4 * block_b * D * x_bytes                               # in+out, 2-buffered
              + 2 * (L * D * D * w_bytes + L * D * 4)                 # resident weights/bias
              + 8 * block_b * D * 4                                   # elementwise temps
              + (2 << 20))                                            # headroom
    cp_kwargs = dict(dimension_semantics=("parallel",))               # batch tiles independent
    if budget > (12 << 20):
        # Raise the scoped-VMEM limit only when a big tile needs it (v5e default
        # is 16 MiB); capped well below any physical VMEM size we target.
        cp_kwargs["vmem_limit_bytes"] = min(int(budget * 1.25), 100 << 20)

    out = pl.pallas_call(
        kernel,
        out_shape=jax.ShapeDtypeStruct((B, D), x.dtype),
        grid_spec=pltpu.PrefetchScalarGridSpec(
            num_scalar_prefetch=0,
            grid=(grid_b,),
            in_specs=[
                pl.BlockSpec((block_b, D), lambda i: (i, 0)),   # batch tile
                _resident_spec((L, D, D)),                      # ALL layer weights resident
                _resident_spec((L, D)),                         # ALL layer biases resident
            ],
            out_specs=pl.BlockSpec((block_b, D), lambda i: (i, 0)),
        ),
        compiler_params=pltpu.CompilerParams(**cp_kwargs),
    )(x, w_eff, b_eff)

    if dlatent_broadcast is not None:
        # x.unsqueeze(1).expand(-1, dlatent_broadcast, -1) -- pure glue, no compute.
        out = jnp.broadcast_to(out[:, None, :], (B, dlatent_broadcast, D))
    return out


# ---------------------------------------------------------------------------
# Parameter setup mirroring EqualizedLinear.__init__ / forward semantics.
# ---------------------------------------------------------------------------
def make_raw_params(key, latent_size, mapping_layers=8, mapping_lrmul=0.01,
                    use_wscale=True, gain=np.sqrt(2.0)):
    """Raw (W, b) per layer: W ~ N(0, init_std^2) of shape (out, in), b = 0."""
    D = latent_size
    he_std = gain * D ** (-0.5)
    init_std = (1.0 / mapping_lrmul) if use_wscale else (he_std / mapping_lrmul)
    raw_ws, raw_bs = [], []
    for _ in range(mapping_layers):
        key, sub = jax.random.split(key)
        raw_ws.append(jax.random.normal(sub, (D, D), jnp.float32) * init_std)
        raw_bs.append(jnp.zeros((D,), jnp.float32))
    return raw_ws, raw_bs


def pack_effective_params(raw_ws, raw_bs, mapping_lrmul=0.01, use_wscale=True,
                          gain=np.sqrt(2.0), weight_dtype=jnp.float32):
    """Fold w_mul / b_mul into the parameters; weights laid out (L, in, out),
    biases dense (L, D) f32 (kernel casts them to its elementwise dtype)."""
    D = raw_ws[0].shape[1]
    he_std = gain * D ** (-0.5)
    w_mul = he_std * mapping_lrmul if use_wscale else mapping_lrmul
    b_mul = mapping_lrmul
    w_eff = jnp.stack([(W * w_mul).T for W in raw_ws], axis=0).astype(weight_dtype)
    b_eff = jnp.stack([b * b_mul for b in raw_bs], axis=0).astype(jnp.float32)
    return w_eff, b_eff


def reference_forward(x, raw_ws, raw_bs, lrmul=0.01, gain=np.sqrt(2.0),
                      use_wscale=True, normalize_latents=False, eps=1e-8):
    """Pure-JAX reference reproducing the PyTorch module."""
    h = x
    if normalize_latents:
        h = h * lax.rsqrt(jnp.mean(h * h, axis=1, keepdims=True) + eps)
    D = x.shape[1]
    he_std = gain * D ** (-0.5)
    w_mul = he_std * lrmul if use_wscale else lrmul
    for W, b in zip(raw_ws, raw_bs):
        h = h @ (W * w_mul).T + b * lrmul          # F.linear
        h = jnp.where(h >= 0, h, 0.2 * h)          # LeakyReLU(0.2)
    return h


if __name__ == "__main__":
    # Small shapes consistent with the module (all feature dims equal, as defaults).
    B = 8
    D = 128          # latent_size = dlatent_size = mapping_fmaps
    L = 8            # mapping_layers

    key = jax.random.PRNGKey(0)
    key, kx = jax.random.split(key)
    x = jax.random.normal(kx, (B, D), jnp.float32)

    raw_ws, raw_bs = make_raw_params(key, D, mapping_layers=L)
    w_f32, b_eff = pack_effective_params(raw_ws, raw_bs, weight_dtype=jnp.float32)
    w_bf16, _ = pack_effective_params(raw_ws, raw_bs, weight_dtype=jnp.bfloat16)

    ref = reference_forward(x, raw_ws, raw_bs)

    # f32 path (exact semantics).
    fwd = jax.jit(functools.partial(gmapping_forward, dlatent_broadcast=None))
    out = jax.block_until_ready(fwd(x, w_f32, b_eff))
    np.testing.assert_allclose(np.asarray(out), np.asarray(ref), rtol=1e-5, atol=1e-5)

    # bf16-weight path (f32 accumulation; bf16 elementwise on v6e/v7x).
    out_bf16 = jax.block_until_ready(fwd(x, w_bf16, b_eff))
    np.testing.assert_allclose(np.asarray(out_bf16), np.asarray(ref),
                               rtol=1e-1, atol=1.5e-1)

    # normalize_latents=True path (PixelNormLayer in front of the chain).
    fwd_n = jax.jit(functools.partial(gmapping_forward, normalize_latents=True))
    out_n = jax.block_until_ready(fwd_n(x, w_f32, b_eff))
    ref_n = reference_forward(x, raw_ws, raw_bs, normalize_latents=True)
    np.testing.assert_allclose(np.asarray(out_n), np.asarray(ref_n), rtol=1e-3, atol=1e-3)

    # dlatent_broadcast glue path (unsqueeze + expand outside the kernel).
    fwd_b = jax.jit(functools.partial(gmapping_forward, dlatent_broadcast=14))
    out_b = jax.block_until_ready(fwd_b(x, w_f32, b_eff))
    assert out_b.shape == (B, 14, D)
    np.testing.assert_allclose(np.asarray(out_b[:, 0, :]), np.asarray(ref),
                               rtol=1e-5, atol=1e-5)

    # Larger ragged batch: grid > 1, B % block_b != 0 (partial last tile),
    # interleaved half-tiles inside the body.
    B2 = 200
    key, kx2 = jax.random.split(key)
    x2 = jax.random.normal(kx2, (B2, D), jnp.float32)
    ref2 = reference_forward(x2, raw_ws, raw_bs)
    fwd2 = jax.jit(functools.partial(gmapping_forward, block_b=128))
    out2 = jax.block_until_ready(fwd2(x2, w_f32, b_eff))
    np.testing.assert_allclose(np.asarray(out2), np.asarray(ref2), rtol=1e-5, atol=1e-5)

    print("KERNEL_OK")
</pallas_src>

<mosaic_0001>
module attributes {stable_mosaic.version = 11 : i64} {
  func.func @_gmapping_kernel(%arg0: i32, %arg1: memref<8x128xf32, #tpu.memory_space<vmem>>, %arg2: memref<8x128x128xf32, #tpu.memory_space<vmem>>, %arg3: memref<8x128xf32, #tpu.memory_space<vmem>>, %arg4: memref<8x128xf32, #tpu.memory_space<vmem>>) attributes {dimension_semantics = [#tpu.dimension_semantics<parallel>], iteration_bounds = array<i64: 1>, scalar_prefetch = 0 : i64, scratch_operands = 0 : i64, tpu.core_type = #tpu.core_type<tc>, window_params = [{transform_indices = @transform_0, window_bounds = array<i64: 8, 128>}, {pipeline_mode = #tpu.pipeline_mode<synchronous>, transform_indices = @transform_1, window_bounds = array<i64: 8, 128, 128>}, {pipeline_mode = #tpu.pipeline_mode<synchronous>, transform_indices = @transform_2, window_bounds = array<i64: 8, 128>}, {transform_indices = @transform_3, window_bounds = array<i64: 8, 128>}]} {
    %c0 = arith.constant 0 : index
    %c0_0 = arith.constant 0 : index
    %0 = vector.load %arg1[%c0, %c0_0] : memref<8x128xf32, #tpu.memory_space<vmem>>, vector<8x128xf32>
    %c0_1 = arith.constant 0 : index
    %c0_2 = arith.constant 0 : index
    %c0_3 = arith.constant 0 : index
    %1 = vector.load %arg2[%c0_1, %c0_2, %c0_3] : memref<8x128x128xf32, #tpu.memory_space<vmem>>, vector<1x128x128xf32>
    %2 = vector.shape_cast %1 : vector<1x128x128xf32> to vector<128x128xf32>
    %c0_4 = arith.constant 0 : index
    %c0_5 = arith.constant 0 : index
    %3 = vector.load %arg3[%c0_4, %c0_5] : memref<8x128xf32, #tpu.memory_space<vmem>>, vector<1x128xf32>
    %cst = arith.constant dense<0.000000e+00> : vector<8x128xf32>
    %4 = tpu.matmul %0, %2, %cst {dimension_numbers = #tpu.dot_dimension_numbers<[1], [0], [0], [1], [0, 0, 1, 1], [], []>} : vector<8x128xf32>, vector<128x128xf32>, vector<8x128xf32> -> vector<8x128xf32>
    %5 = vector.broadcast %3 : vector<1x128xf32> to vector<8x128xf32>
    %6 = arith.addf %4, %5 : vector<8x128xf32>
    %cst_6 = arith.constant 2.000000e-01 : f32
    %7 = vector.broadcast %cst_6 : f32 to vector<8x128xf32>
    %8 = arith.mulf %7, %6 : vector<8x128xf32>
    %9 = arith.maximumf %6, %8 : vector<8x128xf32>
    %c1 = arith.constant 1 : index
    %c0_7 = arith.constant 0 : index
    %c0_8 = arith.constant 0 : index
    %10 = vector.load %arg2[%c1, %c0_7, %c0_8] : memref<8x128x128xf32, #tpu.memory_space<vmem>>, vector<1x128x128xf32>
    %11 = vector.shape_cast %10 : vector<1x128x128xf32> to vector<128x128xf32>
    %c1_9 = arith.constant 1 : index
    %c0_10 = arith.constant 0 : index
    %12 = vector.load %arg3[%c1_9, %c0_10] : memref<8x128xf32, #tpu.memory_space<vmem>>, vector<1x128xf32>
    %cst_11 = arith.constant dense<0.000000e+00> : vector<8x128xf32>
    %13 = tpu.matmul %9, %11, %cst_11 {dimension_numbers = #tpu.dot_dimension_numbers<[1], [0], [0], [1], [0, 0, 1, 1], [], []>} : vector<8x128xf32>, vector<128x128xf32>, vector<8x128xf32> -> vector<8x128xf32>
    %14 = vector.broadcast %12 : vector<1x128xf32> to vector<8x128xf32>
    %15 = arith.addf %13, %14 : vector<8x128xf32>
    %cst_12 = arith.constant 2.000000e-01 : f32
    %16 = vector.broadcast %cst_12 : f32 to vector<8x128xf32>
    %17 = arith.mulf %16, %15 : vector<8x128xf32>
    %18 = arith.maximumf %15, %17 : vector<8x128xf32>
    %c2 = arith.constant 2 : index
    %c0_13 = arith.constant 0 : index
    %c0_14 = arith.constant 0 : index
    %19 = vector.load %arg2[%c2, %c0_13, %c0_14] : memref<8x128x128xf32, #tpu.memory_space<vmem>>, vector<1x128x128xf32>
    %20 = vector.shape_cast %19 : vector<1x128x128xf32> to vector<128x128xf32>
    %c2_15 = arith.constant 2 : index
    %c0_16 = arith.constant 0 : index
    %21 = vector.load %arg3[%c2_15, %c0_16] : memref<8x128xf32, #tpu.memory_space<vmem>>, vector<1x128xf32>
    %cst_17 = arith.constant dense<0.000000e+00> : vector<8x128xf32>
    %22 = tpu.matmul %18, %20, %cst_17 {dimension_numbers = #tpu.dot_dimension_numbers<[1], [0], [0], [1], [0, 0, 1, 1], [], []>} : vector<8x128xf32>, vector<128x128xf32>, vector<8x128xf32> -> vector<8x128xf32>
    %23 = vector.broadcast %21 : vector<1x128xf32> to vector<8x128xf32>
    %24 = arith.addf %22, %23 : vector<8x128xf32>
    %cst_18 = arith.constant 2.000000e-01 : f32
    %25 = vector.broadcast %cst_18 : f32 to vector<8x128xf32>
    %26 = arith.mulf %25, %24 : vector<8x128xf32>
    %27 = arith.maximumf %24, %26 : vector<8x128xf32>
    %c3 = arith.constant 3 : index
    %c0_19 = arith.constant 0 : index
    %c0_20 = arith.constant 0 : index
    %28 = vector.load %arg2[%c3, %c0_19, %c0_20] : memref<8x128x128xf32, #tpu.memory_space<vmem>>, vector<1x128x128xf32>
    %29 = vector.shape_cast %28 : vector<1x128x128xf32> to vector<128x128xf32>
    %c3_21 = arith.constant 3 : index
    %c0_22 = arith.constant 0 : index
    %30 = vector.load %arg3[%c3_21, %c0_22] : memref<8x128xf32, #tpu.memory_space<vmem>>, vector<1x128xf32>
    %cst_23 = arith.constant dense<0.000000e+00> : vector<8x128xf32>
    %31 = tpu.matmul %27, %29, %cst_23 {dimension_numbers = #tpu.dot_dimension_numbers<[1], [0], [0], [1], [0, 0, 1, 1], [], []>} : vector<8x128xf32>, vector<128x128xf32>, vector<8x128xf32> -> vector<8x128xf32>
    %32 = vector.broadcast %30 : vector<1x128xf32> to vector<8x128xf32>
    %33 = arith.addf %31, %32 : vector<8x128xf32>
    %cst_24 = arith.constant 2.000000e-01 : f32
    %34 = vector.broadcast %cst_24 : f32 to vector<8x128xf32>
    %35 = arith.mulf %34, %33 : vector<8x128xf32>
    %36 = arith.maximumf %33, %35 : vector<8x128xf32>
    %c4 = arith.constant 4 : index
    %c0_25 = arith.constant 0 : index
    %c0_26 = arith.constant 0 : index
    %37 = vector.load %arg2[%c4, %c0_25, %c0_26] : memref<8x128x128xf32, #tpu.memory_space<vmem>>, vector<1x128x128xf32>
    %38 = vector.shape_cast %37 : vector<1x128x128xf32> to vector<128x128xf32>
    %c4_27 = arith.constant 4 : index
    %c0_28 = arith.constant 0 : index
    %39 = vector.load %arg3[%c4_27, %c0_28] : memref<8x128xf32, #tpu.memory_space<vmem>>, vector<1x128xf32>
    %cst_29 = arith.constant dense<0.000000e+00> : vector<8x128xf32>
    %40 = tpu.matmul %36, %38, %cst_29 {dimension_numbers = #tpu.dot_dimension_numbers<[1], [0], [0], [1], [0, 0, 1, 1], [], []>} : vector<8x128xf32>, vector<128x128xf32>, vector<8x128xf32> -> vector<8x128xf32>
    %41 = vector.broadcast %39 : vector<1x128xf32> to vector<8x128xf32>
    %42 = arith.addf %40, %41 : vector<8x128xf32>
    %cst_30 = arith.constant 2.000000e-01 : f32
    %43 = vector.broadcast %cst_30 : f32 to vector<8x128xf32>
    %44 = arith.mulf %43, %42 : vector<8x128xf32>
    %45 = arith.maximumf %42, %44 : vector<8x128xf32>
    %c5 = arith.constant 5 : index
    %c0_31 = arith.constant 0 : index
    %c0_32 = arith.constant 0 : index
    %46 = vector.load %arg2[%c5, %c0_31, %c0_32] : memref<8x128x128xf32, #tpu.memory_space<vmem>>, vector<1x128x128xf32>
    %47 = vector.shape_cast %46 : vector<1x128x128xf32> to vector<128x128xf32>
    %c5_33 = arith.constant 5 : index
    %c0_34 = arith.constant 0 : index
    %48 = vector.load %arg3[%c5_33, %c0_34] : memref<8x128xf32, #tpu.memory_space<vmem>>, vector<1x128xf32>
    %cst_35 = arith.constant dense<0.000000e+00> : vector<8x128xf32>
    %49 = tpu.matmul %45, %47, %cst_35 {dimension_numbers = #tpu.dot_dimension_numbers<[1], [0], [0], [1], [0, 0, 1, 1], [], []>} : vector<8x128xf32>, vector<128x128xf32>, vector<8x128xf32> -> vector<8x128xf32>
    %50 = vector.broadcast %48 : vector<1x128xf32> to vector<8x128xf32>
    %51 = arith.addf %49, %50 : vector<8x128xf32>
    %cst_36 = arith.constant 2.000000e-01 : f32
    %52 = vector.broadcast %cst_36 : f32 to vector<8x128xf32>
    %53 = arith.mulf %52, %51 : vector<8x128xf32>
    %54 = arith.maximumf %51, %53 : vector<8x128xf32>
    %c6 = arith.constant 6 : index
    %c0_37 = arith.constant 0 : index
    %c0_38 = arith.constant 0 : index
    %55 = vector.load %arg2[%c6, %c0_37, %c0_38] : memref<8x128x128xf32, #tpu.memory_space<vmem>>, vector<1x128x128xf32>
    %56 = vector.shape_cast %55 : vector<1x128x128xf32> to vector<128x128xf32>
    %c6_39 = arith.constant 6 : index
    %c0_40 = arith.constant 0 : index
    %57 = vector.load %arg3[%c6_39, %c0_40] : memref<8x128xf32, #tpu.memory_space<vmem>>, vector<1x128xf32>
    %cst_41 = arith.constant dense<0.000000e+00> : vector<8x128xf32>
    %58 = tpu.matmul %54, %56, %cst_41 {dimension_numbers = #tpu.dot_dimension_numbers<[1], [0], [0], [1], [0, 0, 1, 1], [], []>} : vector<8x128xf32>, vector<128x128xf32>, vector<8x128xf32> -> vector<8x128xf32>
    %59 = vector.broadcast %57 : vector<1x128xf32> to vector<8x128xf32>
    %60 = arith.addf %58, %59 : vector<8x128xf32>
    %cst_42 = arith.constant 2.000000e-01 : f32
    %61 = vector.broadcast %cst_42 : f32 to vector<8x128xf32>
    %62 = arith.mulf %61, %60 : vector<8x128xf32>
    %63 = arith.maximumf %60, %62 : vector<8x128xf32>
    %c7 = arith.constant 7 : index
    %c0_43 = arith.constant 0 : index
    %c0_44 = arith.constant 0 : index
    %64 = vector.load %arg2[%c7, %c0_43, %c0_44] : memref<8x128x128xf32, #tpu.memory_space<vmem>>, vector<1x128x128xf32>
    %65 = vector.shape_cast %64 : vector<1x128x128xf32> to vector<128x128xf32>
    %c7_45 = arith.constant 7 : index
    %c0_46 = arith.constant 0 : index
    %66 = vector.load %arg3[%c7_45, %c0_46] : memref<8x128xf32, #tpu.memory_space<vmem>>, vector<1x128xf32>
    %cst_47 = arith.constant dense<0.000000e+00> : vector<8x128xf32>
    %67 = tpu.matmul %63, %65, %cst_47 {dimension_numbers = #tpu.dot_dimension_numbers<[1], [0], [0], [1], [0, 0, 1, 1], [], []>} : vector<8x128xf32>, vector<128x128xf32>, vector<8x128xf32> -> vector<8x128xf32>
    %68 = vector.broadcast %66 : vector<1x128xf32> to vector<8x128xf32>
    %69 = arith.addf %67, %68 : vector<8x128xf32>
    %cst_48 = arith.constant 2.000000e-01 : f32
    %70 = vector.broadcast %cst_48 : f32 to vector<8x128xf32>
    %71 = arith.mulf %70, %69 : vector<8x128xf32>
    %72 = arith.maximumf %69, %71 : vector<8x128xf32>
    %c0_49 = arith.constant 0 : index
    %c0_50 = arith.constant 0 : index
    %73 = vector.load %arg4[%c0_49, %c0_50] : memref<8x128xf32, #tpu.memory_space<vmem>>, vector<8x128xf32>
    tpu.vector_store %arg4[%c0_49, %c0_50], %72 {strides = array<i32>} : memref<8x128xf32, #tpu.memory_space<vmem>>, vector<8x128xf32>,
    return
  }
  func.func @transform_0(%arg0: i32) -> (i32, i32) {
    %c0_i32 = arith.constant 0 : i32
    %c0_i32_0 = arith.constant 0 : i32
    return %arg0, %c0_i32 : i32, i32
  }
  func.func @transform_1(%arg0: i32) -> (i32, i32, i32) {
    %c0_i32 = arith.constant 0 : i32
    %c0_i32_0 = arith.constant 0 : i32
    %c0_i32_1 = arith.constant 0 : i32
    %c0_i32_2 = arith.constant 0 : i32
    return %c0_i32, %c0_i32_0, %c0_i32_1 : i32, i32, i32
  }
  func.func @transform_2(%arg0: i32) -> (i32, i32) {
    %c0_i32 = arith.constant 0 : i32
    %c0_i32_0 = arith.constant 0 : i32
    %c0_i32_1 = arith.constant 0 : i32
    return %c0_i32, %c0_i32_0 : i32, i32
  }
  func.func @transform_3(%arg0: i32) -> (i32, i32) {
    %c0_i32 = arith.constant 0 : i32
    %c0_i32_0 = arith.constant 0 : i32
    return %arg0, %c0_i32 : i32, i32
  }
}

</mosaic_0001>

<bundles_post_ra>
// kernel: gmapping_forward.1
= control target key start
LH: loop header
LB: loop body
LE: loop exit
PB: predicated region body
PF: predicated region fallthrough
CT: control target
= control target key end

     0   :  { %8 = vsyncpa [#allocation3], 0  ;;  %s559_s0 = inlined_call_operand.hbm [shape: f32[8,128], index: 0, kind: input, shape index: {}]   ;;  %s560_s1 = inlined_call_operand.hbm [shape: f32[8,128,128], index: 1, kind: input, shape index: {}]   ;;  %s561_s2 = inlined_call_operand.hbm [shape: f32[8,128], index: 2, kind: input, shape index: {}]   ;;  %s562_s3 = inlined_call_operand.hbm [shape: f32[8,128], index: 3, kind: output, shape index: {}]  }
   0x1   :  { %9 = vsyncpa [#allocation6], 0  ;;  %s26_s14 = sshll.u32 %s560_s1, 4  ;;  %s27_s14 = int_to_ptr.hbm [resolvable:$true] %s26_s14 }
   0x2   :  { %10 = vsyncpa [#allocation4], 0  ;;  %s521_s15 = smov [#allocation5]   ;;  %s16_s19 = sshll.u32 %s559_s0, 4  ;;  %s17_s19 = int_to_ptr.hbm [resolvable:$true] %s16_s19 }
   0x3   :  { %s28_s16 = sshll.u32 %s521_s15, 4  ;;  %s522_s20 = smov 128   ;;  %s29_s16 = int_to_ptr.vmem [resolvable:$true] %s28_s16 }
   0x4   :  { %s523_s21 = smov 8   ;;  %s524_s22 = smov [#allocation2]  }
   0x5   :  { %34 = dma.hbm_to_vmem [thread:$0]  %s27_s14, 16384, %s29_s16, [#allocation6], %s522_s20, %s522_s20, %s523_s21  }
   0x6   :  { %s18_s23 = sshll.u32 %s524_s22, 4  ;;  %s40_s26 = sshll.u32 %s561_s2, 4  ;;  %s19_s23 = int_to_ptr.vmem [resolvable:$true] %s18_s23  ;;  %s41_s26 = int_to_ptr.hbm [resolvable:$true] %s40_s26 }
   0x7   :  { %21 = dma.hbm_to_vmem [thread:$0]  %s17_s19, 128, %s19_s23, [#allocation3]  }
   0x8   :  { %s525_s1 = smov [#allocation7]  }
   0x9   :  { %s42_s27 = sshll.u32 %s525_s1, 4  ;;  %s43_s27 = int_to_ptr.vmem [resolvable:$true] %s42_s27 }
   0xa   :  { %45 = dma.hbm_to_vmem [thread:$0]  %s41_s26, 128, %s43_s27, [#allocation6]  }
   0xb   :  { %515 = dma.done.wait [#allocation3], 128  }
   0xc   :  { %516 = vsyncadd [#allocation3], 4294967168 }
   0xd   :  { %517 = dma.done.wait [#allocation6], 16512  }
   0xe   :  { %518 = vsyncadd [#allocation6], 4294950784  ;;  %v74_v0 = vld [vmem:[#allocation5 + $0x78] sm:$0xff]  ;;  %v73_v1 = vld [vmem:[#allocation5 + $0x70] sm:$0xff]  ;;  %s526_s0 = smov [#allocation8]   ;;  %s394_s30 = sshll.u32 %s562_s3, 4  ;;  %s395_s30 = int_to_ptr.hbm [resolvable:$true] %s394_s30 }
   0xf   :  { %77 = vmatpush.msra.mxu0 %v74_v0  ;;  %v72_v2 = vld [vmem:[#allocation5 + $0x68] sm:$0xff]  ;;  %v71_v3 = vld [vmem:[#allocation5 + $0x60] sm:$0xff]  ;;  %v115_v4 = vld [vmem:[#allocation5 + $0xf8] sm:$0xff]  ;;  %s392_s2 = sshll.u32 %s526_s0, 4  ;;  %s393_s2 = int_to_ptr.vmem [resolvable:$true] %s392_s2 }
  0x10   :  { %v70_v5 = vld [vmem:[#allocation5 + $0x58] sm:$0xff]  ;;  %118 = vmatpush.msra.mxu1 %v115_v4  ;;  %v114_v6 = vld [vmem:[#allocation5 + $0xf0] sm:$0xff]  ;;  %v113_v7 = vld [vmem:[#allocation5 + $0xe8] sm:$0xff] }
  0x11   :  { %78 = vmatpush.msra.mxu0 %v73_v1  ;;  %v69_v8 = vld [vmem:[#allocation5 + $0x50] sm:$0xff]  ;;  %v68_v9 = vld [vmem:[#allocation5 + $0x48] sm:$0xff]  ;;  %v112_v10 = vld [vmem:[#allocation5 + $0xe0] sm:$0xff] }
  0x12   :  { %119 = vmatpush.msra.mxu1 %v114_v6  ;;  %v111_v11 = vld [vmem:[#allocation5 + $0xd8] sm:$0xff]  ;;  %v67_v12 = vld [vmem:[#allocation5 + $0x40] sm:$0xff]  ;;  %v110_v13 = vld [vmem:[#allocation5 + $0xd0] sm:$0xff] }
  0x13   :  { %79 = vmatpush.msra.mxu0 %v72_v2  ;;  %v66_v14 = vld [vmem:[#allocation5 + $0x38] sm:$0xff]  ;;  %v109_v15 = vld [vmem:[#allocation5 + $0xc8] sm:$0xff]  ;;  %v65_v16 = vld [vmem:[#allocation5 + $0x30] sm:$0xff] }
  0x14   :  { %120 = vmatpush.msra.mxu1 %v113_v7  ;;  %v108_v17 = vld [vmem:[#allocation5 + $0xc0] sm:$0xff]  ;;  %v64_v18 = vld [vmem:[#allocation5 + $0x28] sm:$0xff]  ;;  %v107_v19 = vld [vmem:[#allocation5 + $0xb8] sm:$0xff] }
  0x15   :  { %80 = vmatpush.msra.mxu0 %v71_v3  ;;  %v63_v20 = vld [vmem:[#allocation5 + $0x20] sm:$0xff]  ;;  %v106_v21 = vld [vmem:[#allocation5 + $0xb0] sm:$0xff]  ;;  %v62_v22 = vld [vmem:[#allocation5 + $0x18] sm:$0xff] }
  0x16   :  { %121 = vmatpush.msra.mxu1 %v112_v10  ;;  %v105_v23 = vld [vmem:[#allocation5 + $0xa8] sm:$0xff]  ;;  %v61_v24 = vld [vmem:[#allocation5 + $0x10] sm:$0xff]  ;;  %v104_v25 = vld [vmem:[#allocation5 + $0xa0] sm:$0xff] }
  0x17   :  { %81 = vmatpush.msra.mxu0 %v70_v5  ;;  %v60_v26 = vld [vmem:[#allocation5 + $0x8] sm:$0xff]  ;;  %v59_v27 = vld [vmem:[#allocation5] sm:$0xff]  ;;  %v58_v28 = vld [vmem:[#allocation2] sm:$0xff] }
  0x18   :  { %122 = vmatpush.msra.mxu1 %v111_v11  ;;  %v103_v29 = vld [vmem:[#allocation5 + $0x98] sm:$0xff]  ;;  %v102_v30 = vld [vmem:[#allocation5 + $0x90] sm:$0xff]  ;;  %v101_v31 = vld [vmem:[#allocation5 + $0x88] sm:$0xff] }
  0x19   :  { %82 = vmatpush.msra.mxu0 %v69_v8  ;;  %v100_v32 = vld [vmem:[#allocation5 + $0x80] sm:$0xff]  ;;  %v156_v33 = vld [vmem:[#allocation5 + $0x178] sm:$0xff]  ;;  %v155_v34 = vld [vmem:[#allocation5 + $0x170] sm:$0xff] }
  0x1a   :  { %123 = vmatpush.msra.mxu1 %v110_v13  ;;  %159 = vmatpush.msra.mxu2 %v156_v33  ;;  %v154_v35 = vld [vmem:[#allocation5 + $0x168] sm:$0xff]  ;;  %v153_v36 = vld [vmem:[#allocation5 + $0x160] sm:$0xff]  ;;  %v152_v37 = vld [vmem:[#allocation5 + $0x158] sm:$0xff] }
  0x1b   :  { %83 = vmatpush.msra.mxu0 %v68_v9  ;;  %v151_v38 = vld [vmem:[#allocation5 + $0x150] sm:$0xff]  ;;  %v150_v39 = vld [vmem:[#allocation5 + $0x148] sm:$0xff]  ;;  %v149_v40 = vld [vmem:[#allocation5 + $0x140] sm:$0xff] }
  0x1c   :  { %124 = vmatpush.msra.mxu1 %v109_v15  ;;  %160 = vmatpush.msra.mxu2 %v155_v34  ;;  %v148_v41 = vld [vmem:[#allocation5 + $0x138] sm:$0xff]  ;;  %v147_v42 = vld [vmem:[#allocation5 + $0x130] sm:$0xff]  ;;  %v146_v43 = vld [vmem:[#allocation5 + $0x128] sm:$0xff] }
  0x1d   :  { %84 = vmatpush.msra.mxu0 %v67_v12  ;;  %v145_v44 = vld [vmem:[#allocation5 + $0x120] sm:$0xff]  ;;  %v144_v50 = vld [vmem:[#allocation5 + $0x118] sm:$0xff]  ;;  %v143_v51 = vld [vmem:[#allocation5 + $0x110] sm:$0xff] }
  0x1e   :  { %125 = vmatpush.msra.mxu1 %v108_v17  ;;  %161 = vmatpush.msra.mxu2 %v154_v35  ;;  %v411_v45 = vld [vmem:[#allocation7] ss:$0 sm:$0xff]  ;;  %v142_v52 = vld [vmem:[#allocation5 + $0x108] sm:$0xff]  ;;  %v197_v54 = vld [vmem:[#allocation5 + $0x1f8] sm:$0xff] }
  0x1f   :  { %85 = vmatpush.msra.mxu0 %v66_v14  ;;  %v141_v53 = vld [vmem:[#allocation5 + $0x100] sm:$0xff]  ;;  %v196_v55 = vld [vmem:[#allocation5 + $0x1f0] sm:$0xff]  ;;  %200 = vmatpush.msra.mxu3 %v197_v54  ;;  %v195_v56 = vld [vmem:[#allocation5 + $0x1e8] sm:$0xff] }
  0x20   :  { %126 = vmatpush.msra.mxu1 %v107_v19  ;;  %162 = vmatpush.msra.mxu2 %v153_v36  ;;  %v194_v57 = vld [vmem:[#allocation5 + $0x1e0] sm:$0xff]  ;;  %v193_v58 = vld [vmem:[#allocation5 + $0x1d8] sm:$0xff]  ;;  %v192_v59 = vld [vmem:[#allocation5 + $0x1d0] sm:$0xff] }
  0x21   :  { %86 = vmatpush.msra.mxu0 %v65_v16  ;;  %201 = vmatpush.msra.mxu3 %v196_v55  ;;  %v191_v60 = vld [vmem:[#allocation5 + $0x1c8] sm:$0xff]  ;;  %v190_v61 = vld [vmem:[#allocation5 + $0x1c0] sm:$0xff]  ;;  %v189_v62 = vld [vmem:[#allocation5 + $0x1b8] sm:$0xff] }
  0x22   :  { %127 = vmatpush.msra.mxu1 %v106_v21  ;;  %163 = vmatpush.msra.mxu2 %v152_v37  ;;  %v188_v63 = vld [vmem:[#allocation5 + $0x1b0] sm:$0xff]  ;;  %v187_v0 = vld [vmem:[#allocation5 + $0x1a8] sm:$0xff]  ;;  %v186_v1 = vld [vmem:[#allocation5 + $0x1a0] sm:$0xff] }
  0x23   :  { %87 = vmatpush.msra.mxu0 %v64_v18  ;;  %202 = vmatpush.msra.mxu3 %v195_v56  ;;  %v412_v2 = vld [vmem:[#allocation7 + $0x1] ss:$0 sm:$0xff]  ;;  %v185_v7 = vld [vmem:[#allocation5 + $0x198] sm:$0xff]  ;;  %v184_v8 = vld [vmem:[#allocation5 + $0x190] sm:$0xff] }
  0x24   :  { %128 = vmatpush.msra.mxu1 %v105_v23  ;;  %164 = vmatpush.msra.mxu2 %v151_v38  ;;  %v183_v9 = vld [vmem:[#allocation5 + $0x188] sm:$0xff]  ;;  %v182_v10 = vld [vmem:[#allocation5 + $0x180] sm:$0xff]  ;;  %v238_v11 = vld [vmem:[#allocation5 + $0x278] sm:$0xff] }
  0x25   :  { %88 = vmatpush.msra.mxu0 %v63_v20  ;;  %203 = vmatpush.msra.mxu3 %v194_v57  ;;  %v237_v12 = vld [vmem:[#allocation5 + $0x270] sm:$0xff]  ;;  %v236_v13 = vld [vmem:[#allocation5 + $0x268] sm:$0xff]  ;;  %v235_v14 = vld [vmem:[#allocation5 + $0x260] sm:$0xff] }
  0x26   :  { %129 = vmatpush.msra.mxu1 %v104_v25  ;;  %165 = vmatpush.msra.mxu2 %v150_v39  ;;  %v234_v15 = vld [vmem:[#allocation5 + $0x258] sm:$0xff]  ;;  %v233_v16 = vld [vmem:[#allocation5 + $0x250] sm:$0xff]  ;;  %v232_v17 = vld [vmem:[#allocation5 + $0x248] sm:$0xff] }
  0x27   :  { %89 = vmatpush.msra.mxu0 %v62_v22  ;;  %204 = vmatpush.msra.mxu3 %v193_v58  ;;  %v231_v18 = vld [vmem:[#allocation5 + $0x240] sm:$0xff]  ;;  %v230_v19 = vld [vmem:[#allocation5 + $0x238] sm:$0xff]  ;;  %v229_v20 = vld [vmem:[#allocation5 + $0x230] sm:$0xff] }
  0x28   :  { %130 = vmatpush.msra.mxu1 %v103_v29  ;;  %166 = vmatpush.msra.mxu2 %v149_v40  ;;  %v228_v21 = vld [vmem:[#allocation5 + $0x228] sm:$0xff]  ;;  %v227_v22 = vld [vmem:[#allocation5 + $0x220] sm:$0xff]  ;;  %v225_v29 = vld [vmem:[#allocation5 + $0x210] sm:$0xff] }
  0x29   :  { %90 = vmatpush.msra.mxu0 %v61_v24  ;;  %205 = vmatpush.msra.mxu3 %v192_v59  ;;  %v413_v23 = vld [vmem:[#allocation7 + $0x2] ss:$0 sm:$0xff]  ;;  %v278_v33 = vld [vmem:[#allocation5 + $0x2f0] sm:$0xff]  ;;  %v277_v34 = vld [vmem:[#allocation5 + $0x2e8] sm:$0xff] }
  0x2a   :  { %131 = vmatpush.msra.mxu1 %v102_v30  ;;  %167 = vmatpush.msra.mxu2 %v148_v41  ;;  %v224_v30 = vld [vmem:[#allocation5 + $0x208] sm:$0xff]  ;;  %v276_v35 = vld [vmem:[#allocation5 + $0x2e0] sm:$0xff]  ;;  %v275_v36 = vld [vmem:[#allocation5 + $0x2d8] sm:$0xff] }
  0x2b   :  { %91 = vmatpush.msra.mxu0 %v60_v26  ;;  %206 = vmatpush.msra.mxu3 %v191_v60  ;;  %v274_v37 = vld [vmem:[#allocation5 + $0x2d0] sm:$0xff]  ;;  %v273_v38 = vld [vmem:[#allocation5 + $0x2c8] sm:$0xff]  ;;  %v272_v39 = vld [vmem:[#allocation5 + $0x2c0] sm:$0xff] }
  0x2c   :  { %132 = vmatpush.msra.mxu1 %v101_v31  ;;  %168 = vmatpush.msra.mxu2 %v147_v42  ;;  %v223_v31 = vld [vmem:[#allocation5 + $0x200] sm:$0xff]  ;;  %v271_v40 = vld [vmem:[#allocation5 + $0x2b8] sm:$0xff]  ;;  %v270_v41 = vld [vmem:[#allocation5 + $0x2b0] sm:$0xff] }
  0x2d   :  { %92 = vmatpush.msra.mxu0 %v59_v27  ;;  %207 = vmatpush.msra.mxu3 %v190_v61  ;;  %v269_v42 = vld [vmem:[#allocation5 + $0x2a8] sm:$0xff]  ;;  %v319_v54 = vld [vmem:[#allocation5 + $0x370] sm:$0xff]  ;;  %v317_v56 = vld [vmem:[#allocation5 + $0x360] sm:$0xff] }
  0x2e   :  { %93 = vmatmul.f32.vlgmr.msra.gmra.mxu0 %v58_v28  ;;  %133 = vmatpush.msra.mxu1 %v100_v32  ;;  %v226_v28 = vld [vmem:[#allocation5 + $0x218] sm:$0xff]  ;;  %v318_v55 = vld [vmem:[#allocation5 + $0x368] sm:$0xff]  ;;  %v315_v58 = vld [vmem:[#allocation5 + $0x350] sm:$0xff] }
  0x2f   :  { %169 = vmatpush.msra.mxu2 %v146_v43  ;;  %208 = vmatpush.msra.mxu3 %v189_v62  ;;  %v279_v32 = vld [vmem:[#allocation5 + $0x2f8] sm:$0xff]  ;;  %v268_v43 = vld [vmem:[#allocation5 + $0x2a0] sm:$0xff]  ;;  %v314_v59 = vld [vmem:[#allocation5 + $0x348] sm:$0xff] }
  0x30   :  { %241 = vmatpush.msrb.mxu0 %v238_v11  ;;  %282 = vmatpush.msrb.mxu1 %v279_v32  ;;  %v316_v57 = vld [vmem:[#allocation5 + $0x358] sm:$0xff]  ;;  %v313_v60 = vld [vmem:[#allocation5 + $0x340] sm:$0xff]  ;;  %v311_v62 = vld [vmem:[#allocation5 + $0x330] sm:$0xff] }
  0x31   :  { %170 = vmatpush.msra.mxu2 %v145_v44  ;;  %209 = vmatpush.msra.mxu3 %v188_v63  ;;  %v414_v44 = vld [vmem:[#allocation7 + $0x3] ss:$0 sm:$0xff]  ;;  %v312_v61 = vld [vmem:[#allocation5 + $0x338] sm:$0xff]  ;;  %v310_v63 = vld [vmem:[#allocation5 + $0x328] sm:$0xff] }
  0x32   :  { %242 = vmatpush.msrb.mxu0 %v237_v12  ;;  %283 = vmatpush.msrb.mxu1 %v278_v33  ;;  %v360_v11 = vld [vmem:[#allocation5 + $0x3f0] sm:$0xff]  ;;  %v359_v12 = vld [vmem:[#allocation5 + $0x3e8] sm:$0xff] }
  0x33   :  { %171 = vmatpush.msra.mxu2 %v144_v50  ;;  %210 = vmatpush.msra.mxu3 %v187_v0  ;;  %v266_v50 = vld [vmem:[#allocation5 + $0x290] sm:$0xff]  ;;  %v309_v0 = vld [vmem:[#allocation5 + $0x320] sm:$0xff] }
  0x34   :  { %243 = vmatpush.msrb.mxu0 %v236_v13  ;;  %284 = vmatpush.msrb.mxu1 %v277_v34  ;;  %v358_v13 = vld [vmem:[#allocation5 + $0x3e0] sm:$0xff] }
  0x35   :  { %172 = vmatpush.msra.mxu2 %v143_v51  ;;  %211 = vmatpush.msra.mxu3 %v186_v1  ;;  %v265_v51 = vld [vmem:[#allocation5 + $0x288] sm:$0xff]  ;;  %v415_v1 = vld [vmem:[#allocation7 + $0x4] ss:$0 sm:$0xff] }
  0x36   :  { %244 = vmatpush.msrb.mxu0 %v235_v14  ;;  %285 = vmatpush.msrb.mxu1 %v276_v35  ;;  %v357_v14 = vld [vmem:[#allocation5 + $0x3d8] sm:$0xff] }
  0x37   :  { %173 = vmatpush.msra.mxu2 %v142_v52  ;;  %212 = vmatpush.msra.mxu3 %v185_v7  ;;  %v264_v52 = vld [vmem:[#allocation5 + $0x280] sm:$0xff]  ;;  %v307_v7 = vld [vmem:[#allocation5 + $0x310] sm:$0xff] }
  0x38   :  { %245 = vmatpush.msrb.mxu0 %v234_v15  ;;  %286 = vmatpush.msrb.mxu1 %v275_v36  ;;  %v356_v15 = vld [vmem:[#allocation5 + $0x3d0] sm:$0xff]  ;;  %v418_v36 = vld [vmem:[#allocation7 + $0x7] ss:$0 sm:$0xff] }
  0x39   :  { %174 = vmatpush.msra.mxu2 %v141_v53  ;;  %213 = vmatpush.msra.mxu3 %v184_v8  ;;  %v320_v53 = vld [vmem:[#allocation5 + $0x378] sm:$0xff]  ;;  %v306_v8 = vld [vmem:[#allocation5 + $0x308] sm:$0xff] }
  0x3a   :  { %246 = vmatpush.msrb.mxu0 %v233_v16  ;;  %287 = vmatpush.msrb.mxu1 %v274_v37  ;;  %v355_v16 = vld [vmem:[#allocation5 + $0x3c8] sm:$0xff] }
  0x3b   :  { %214 = vmatpush.msra.mxu3 %v183_v9  ;;  %323 = vmatpush.msrb.mxu2 %v320_v53  ;;  %v305_v9 = vld [vmem:[#allocation5 + $0x300] sm:$0xff] }
  0x3c   :  { %247 = vmatpush.msrb.mxu0 %v232_v17  ;;  %288 = vmatpush.msrb.mxu1 %v273_v38  ;;  %v354_v17 = vld [vmem:[#allocation5 + $0x3c0] sm:$0xff] }
  0x3d   :  { %215 = vmatpush.msra.mxu3 %v182_v10  ;;  %324 = vmatpush.msrb.mxu2 %v319_v54  ;;  %v361_v10 = vld [vmem:[#allocation5 + $0x3f8] sm:$0xff] }
  0x3e   :  { %248 = vmatpush.msrb.mxu0 %v231_v18  ;;  %289 = vmatpush.msrb.mxu1 %v272_v39  ;;  %v353_v18 = vld [vmem:[#allocation5 + $0x3b8] sm:$0xff] }
  0x3f   :  { %325 = vmatpush.msrb.mxu2 %v318_v55  ;;  %364 = vmatpush.msrb.mxu3 %v361_v10 }
  0x40   :  { %249 = vmatpush.msrb.mxu0 %v230_v19  ;;  %290 = vmatpush.msrb.mxu1 %v271_v40  ;;  %v352_v19 = vld [vmem:[#allocation5 + $0x3b0] sm:$0xff] }
  0x41   :  { %326 = vmatpush.msrb.mxu2 %v317_v56  ;;  %365 = vmatpush.msrb.mxu3 %v360_v11 }
  0x42   :  { %250 = vmatpush.msrb.mxu0 %v229_v20  ;;  %291 = vmatpush.msrb.mxu1 %v270_v41  ;;  %v351_v20 = vld [vmem:[#allocation5 + $0x3a8] sm:$0xff] }
  0x43   :  { %327 = vmatpush.msrb.mxu2 %v316_v57  ;;  %366 = vmatpush.msrb.mxu3 %v359_v12 }
  0x44   :  { %251 = vmatpush.msrb.mxu0 %v228_v21  ;;  %292 = vmatpush.msrb.mxu1 %v269_v42  ;;  %v350_v21 = vld [vmem:[#allocation5 + $0x3a0] sm:$0xff] }
  0x45   :  { %328 = vmatpush.msrb.mxu2 %v315_v58  ;;  %367 = vmatpush.msrb.mxu3 %v358_v13 }
  0x46   :  { %252 = vmatpush.msrb.mxu0 %v227_v22  ;;  %293 = vmatpush.msrb.mxu1 %v268_v43  ;;  %v416_v22 = vld [vmem:[#allocation7 + $0x5] ss:$0 sm:$0xff] }
  0x47   :  { %329 = vmatpush.msrb.mxu2 %v314_v59  ;;  %368 = vmatpush.msrb.mxu3 %v357_v14 }
  0x48   :  { %253 = vmatpush.msrb.mxu0 %v226_v28  ;;  %v348_v28 = vld [vmem:[#allocation5 + $0x390] sm:$0xff] }
  0x49   :  { %330 = vmatpush.msrb.mxu2 %v313_v60  ;;  %369 = vmatpush.msrb.mxu3 %v356_v15 }
  0x4a   :  { %254 = vmatpush.msrb.mxu0 %v225_v29  ;;  %v347_v29 = vld [vmem:[#allocation5 + $0x388] sm:$0xff] }
  0x4b   :  { %331 = vmatpush.msrb.mxu2 %v312_v61  ;;  %370 = vmatpush.msrb.mxu3 %v355_v16 }
  0x4c   :  { %255 = vmatpush.msrb.mxu0 %v224_v30  ;;  %v346_v30 = vld [vmem:[#allocation5 + $0x380] sm:$0xff] }
  0x4d   :  { %332 = vmatpush.msrb.mxu2 %v311_v62  ;;  %371 = vmatpush.msrb.mxu3 %v354_v17 }
  0x4e   :  { %256 = vmatpush.msrb.mxu0 %v223_v31  ;;  %v417_v31 = vld [vmem:[#allocation7 + $0x6] ss:$0 sm:$0xff] }
  0x4f   :  { %333 = vmatpush.msrb.mxu2 %v310_v63  ;;  %372 = vmatpush.msrb.mxu3 %v353_v18 }
  0x51   :  { %334 = vmatpush.msrb.mxu2 %v309_v0  ;;  %373 = vmatpush.msrb.mxu3 %v352_v19 }
  0x53   :  { %374 = vmatpush.msrb.mxu3 %v351_v20 }
  0x55   :  { %375 = vmatpush.msrb.mxu3 %v350_v21 }
  0xab   :  { %v94_v46 = vpop.f32.mrf.mxu0 }
  0xac   :  { %v95_v47 = vadd.f32 %v411_v45, %v94_v46 }
  0xae   :  { %v97_v48 = vmul.f32 0.2, %v95_v47 }
  0xb0   :  { %v98_v49 = vmax.f32 %v95_v47, %v97_v48 }
  0xb2   :  { %134 = vmatmul.f32.vlgmr.msra.gmra.mxu1 %v98_v49  ;;  %v267_v49 = vld [vmem:[#allocation5 + $0x298] sm:$0xff] }
  0xb3   :  { %294 = vmatpush.msrb.mxu1 %v267_v49 }
  0xb5   :  { %295 = vmatpush.msrb.mxu1 %v266_v50 }
  0xb7   :  { %296 = vmatpush.msrb.mxu1 %v265_v51 }
  0xb9   :  { %297 = vmatpush.msrb.mxu1 %v264_v52 }
 0x12f   :  { %v135_v3 = vpop.f32.mrf.mxu1 }
 0x130   :  { %v136_v4 = vadd.f32 %v412_v2, %v135_v3 }
 0x132   :  { %v138_v5 = vmul.f32 0.2, %v136_v4 }
 0x134   :  { %v139_v6 = vmax.f32 %v136_v4, %v138_v5 }
 0x136   :  { %175 = vmatmul.f32.vlgmr.msra.gmra.mxu2 %v139_v6  ;;  %v308_v6 = vld [vmem:[#allocation5 + $0x318] sm:$0xff] }
 0x137   :  { %335 = vmatpush.msrb.mxu2 %v308_v6 }
 0x139   :  { %336 = vmatpush.msrb.mxu2 %v307_v7 }
 0x13b   :  { %337 = vmatpush.msrb.mxu2 %v306_v8 }
 0x13d   :  { %338 = vmatpush.msrb.mxu2 %v305_v9 }
 0x1b9   :  { %v176_v24 = vpop.f32.mrf.mxu2 }
 0x1ba   :  { %v177_v25 = vadd.f32 %v413_v23, %v176_v24 }
 0x1bc   :  { %v179_v26 = vmul.f32 0.2, %v177_v25 }
 0x1be   :  { %v180_v27 = vmax.f32 %v177_v25, %v179_v26 }
 0x1c0   :  { %216 = vmatmul.f32.vlgmr.msra.gmra.mxu3 %v180_v27  ;;  %v349_v27 = vld [vmem:[#allocation5 + $0x398] sm:$0xff] }
 0x1c1   :  { %376 = vmatpush.msrb.mxu3 %v349_v27 }
 0x1c3   :  { %377 = vmatpush.msrb.mxu3 %v348_v28 }
 0x1c5   :  { %378 = vmatpush.msrb.mxu3 %v347_v29 }
 0x1c7   :  { %379 = vmatpush.msrb.mxu3 %v346_v30 }
 0x243   :  { %v217_v45 = vpop.f32.mrf.mxu3 }
 0x244   :  { %v218_v46 = vadd.f32 %v414_v44, %v217_v45 }
 0x246   :  { %v220_v47 = vmul.f32 0.2, %v218_v46 }
 0x248   :  { %v221_v48 = vmax.f32 %v218_v46, %v220_v47 }
 0x24a   :  { %257 = vmatmul.f32.vlgmr.msrb.gmra.mxu0 %v221_v48 }
 0x2c7   :  { %v258_v2 = vpop.f32.mrf.mxu0 }
 0x2c8   :  { %v259_v3 = vadd.f32 %v415_v1, %v258_v2 }
 0x2ca   :  { %v261_v4 = vmul.f32 0.2, %v259_v3 }
 0x2cc   :  { %v262_v5 = vmax.f32 %v259_v3, %v261_v4 }
 0x2ce   :  { %298 = vmatmul.f32.vlgmr.msrb.gmra.mxu1 %v262_v5 }
 0x34b   :  { %v299_v23 = vpop.f32.mrf.mxu1 }
 0x34c   :  { %v300_v24 = vadd.f32 %v416_v22, %v299_v23 }
 0x34e   :  { %v302_v25 = vmul.f32 0.2, %v300_v24 }
 0x350   :  { %v303_v26 = vmax.f32 %v300_v24, %v302_v25 }
 0x352   :  { %339 = vmatmul.f32.vlgmr.msrb.gmra.mxu2 %v303_v26 }
 0x3d5   :  { %v340_v32 = vpop.f32.mrf.mxu2 }
 0x3d6   :  { %v341_v33 = vadd.f32 %v417_v31, %v340_v32 }
 0x3d8   :  { %v343_v34 = vmul.f32 0.2, %v341_v33 }
 0x3da   :  { %v344_v35 = vmax.f32 %v341_v33, %v343_v34 }
 0x3dc   :  { %380 = vmatmul.f32.vlgmr.msrb.gmra.mxu3 %v344_v35 }
 0x45f   :  { %v381_v37 = vpop.f32.mrf.mxu3 }
 0x460   :  { %v382_v38 = vadd.f32 %v418_v36, %v381_v37 }
 0x462   :  { %v384_v39 = vmul.f32 0.2, %v382_v38 }
 0x464   :  { %v385_v40 = vmax.f32 %v382_v38, %v384_v39 }
 0x466   :  { %386 = vst [vmem:[#allocation8] sm:$0xff] %v385_v40 }
 0x467   :  { %397 = dma.vmem_to_hbm [thread:$0]  %s393_s2, 128, %s395_s30, [#allocation4]  }
 0x468   :  { %519 = dma.done.wait [#allocation4], 128  }
 0x469   :  { %520 = vsyncadd [#allocation4], 4294967168 }
 0x46a   :  { %402 = vsyncpa [#allocation3], 1 }
 0x46b   :  { %403 = vsyncpa [#allocation6], 1 }
 0x46c   :  { %404 = vsyncpa [#allocation4], 1 }

</bundles_post_ra>
